<compile_context>
chip_gen: v5e
topology: v5e:2x2
jax: 0.10.0
libtpu: 0.0.40
codegen_flags: <defaults>
</compile_context>

<pallas_src>
import functools

import jax
import jax.numpy as jnp
from jax.experimental import pallas as pl
from jax.experimental.pallas import tpu as pltpu


# ~4 MiB of input tile per grid step: big enough that the ~0.35 us per-step
# pipeline overhead and DMA ramp are amortized (>=85% of HBM roofline).
_TARGET_STEP_BYTES = 4 * 1024 * 1024


def _vmem_config():
    """(tile_budget_bytes, vmem_limit_bytes) for this chip generation."""
    cap = 0
    try:
        cap = int(getattr(pltpu.get_tpu_info(), "vmem_capacity_bytes", 0))
    except Exception:
        cap = 0
    if cap >= 100 * 1024 * 1024:            # v5e / v6e: 128 MiB physical VMEM
        return 64 * 1024 * 1024, 96 * 1024 * 1024
    # Conservative default / v7x: 64 MiB physical, 32 MiB scoped default.
    return 24 * 1024 * 1024, 48 * 1024 * 1024


def _pick_batch_tile(n_rows, n_cols, io_itemsize, align, vmem_budget):
    """Largest legal row tile under the VMEM budget / traffic target.

    VMEM accounting per tile row: 2x double-buffered input + 2x double-buffered
    output tiles in the I/O dtype plus ~4 tile-sized f32 in-kernel temporaries
    (x0, x, per-layer intermediates).
    """
    vmem_row_bytes = n_cols * (4 * io_itemsize + 4 * 4)
    cap = max(vmem_budget // max(vmem_row_bytes, 1), align)
    want = max(_TARGET_STEP_BYTES // max(n_cols * io_itemsize, 1), align)
    tile = min(want, cap, n_rows)
    # Keep >= 2 grid steps when the batch allows it (feeds both v7x TCs; the
    # extra ~0.35 us step is noise on v5e/v6e).
    if n_rows >= 2 * align:
        tile = min(tile, (n_rows + 1) // 2)
    if tile >= n_rows:
        return n_rows                       # full-extent block: always legal
    tile = max((tile // align) * align, align)
    return min(tile, n_rows)
    # TODO(synk): for astronomically wide D (one row alone > VMEM budget) a
    # feature-axis tiling of the dot would be needed; such shapes currently
    # fail loudly at compile time rather than silently.


def _crossnet_kernel_rowmajor(x_ref, w_ref, b_ref, o_ref):
    # Natural layout: x_ref (tb, D), D on lanes (unmasked stores iff D%128==0,
    # otherwise masked stores -- still far cheaper than wrapper transposes).
    # w_ref / b_ref: (L, D), VMEM-resident across all grid steps.
    x0 = x_ref[...].astype(jnp.float32)
    w_all = w_ref[...].astype(jnp.float32)        # hoisted: one load + cast
    b_all = b_ref[...].astype(jnp.float32)
    x = x0
    for i in range(w_ref.shape[0]):               # num_layers: small & static -> unroll
        w_i = w_all[i:i + 1, :]                   # (1, D)
        b_i = b_all[i:i + 1, :]                   # (1, D)
        xw = jnp.sum(x * w_i, axis=-1, keepdims=True)     # (tb, 1)
        x = x0 * xw + b_i + x
    o_ref[...] = x.astype(o_ref.dtype)


def _crossnet_kernel_packed(x_ref, w_ref, b_ref, o_ref, *, seg):
    # Packed lane-dense layout: each (128,)-lane row of x_ref holds 128//seg
    # consecutive samples of `seg` features (zero-copy row-major reshape of the
    # (B, D) input).  w_ref / b_ref: (L, 128) = per-layer params tiled across
    # lanes.  The per-sample dot is an exact segmented lane reduction via an
    # XOR-butterfly (pltpu.roll on the XLU + adds/selects on the VPU): each
    # lane ends up holding its segment's dot product, already broadcast.
    x0 = x_ref[...].astype(jnp.float32)
    w_all = w_ref[...].astype(jnp.float32)
    b_all = b_ref[...].astype(jnp.float32)
    lane = jax.lax.broadcasted_iota(jnp.int32, x0.shape, dimension=1)   # hoisted
    x = x0
    for i in range(w_ref.shape[0]):               # num_layers, unrolled
        w_i = w_all[i:i + 1, :]                   # (1, 128)
        b_i = b_all[i:i + 1, :]                   # (1, 128)
        s = x * w_i
        shift = 1
        while shift < seg:                        # log2(seg) exact reduce steps
            from_right = pltpu.roll(s, 128 - shift, axis=1)   # s[l + shift]
            from_left = pltpu.roll(s, shift, axis=1)          # s[l - shift]
            s = s + jnp.where((lane & shift) == 0, from_right, from_left)
            shift *= 2
        x = x0 * s + b_i + x                      # s == xw broadcast per sample
    o_ref[...] = x.astype(o_ref.dtype)


@jax.jit
def crossnet_forward(x, w, b):
    """CrossNet forward.  x: (B, D), w: (L, D), b: (L, D) -> (B, D)."""
    B, D = x.shape
    L = w.shape[0]
    tile_budget, vmem_limit = _vmem_config()
    itemsize = jnp.dtype(x.dtype).itemsize
    sub_align = 8 if itemsize >= 4 else 32 // itemsize    # 8 f32 / 16 bf16 sublanes

    compiler_params = pltpu.CompilerParams(
        dimension_semantics=("parallel",),        # shard batch grid across v7x's 2 TCs
        vmem_limit_bytes=vmem_limit)
    cost = pl.CostEstimate(
        flops=int(5 * L * B * D),
        transcendentals=0,
        bytes_accessed=int(2 * B * D * itemsize + 2 * L * D * 4))

    if D < 128 and 128 % D == 0 and B % (128 // D) == 0:
        # Packed lane-dense path: zero-copy reshape, no transposes, full lanes.
        k = 128 // D
        rows = (B * D) // 128
        x_r = x.reshape(rows, 128)                # free row-major bitcast reshape
        w_t = jnp.tile(w, (1, k)).astype(w.dtype)  # (L, 128), tiny
        b_t = jnp.tile(b, (1, k)).astype(b.dtype)  # (L, 128), tiny
        tr = _pick_batch_tile(rows, 128, itemsize, sub_align, tile_budget)
        out_r = pl.pallas_call(
            functools.partial(_crossnet_kernel_packed, seg=D),
            out_shape=jax.ShapeDtypeStruct((rows, 128), x.dtype),
            grid_spec=pltpu.PrefetchScalarGridSpec(
                num_scalar_prefetch=0,
                grid=(pl.cdiv(rows, tr),),
                in_specs=[
                    pl.BlockSpec((tr, 128), lambda i: (i, 0)),   # packed x tile
                    pl.BlockSpec((L, 128), lambda i: (0, 0)),    # resident weights
                    pl.BlockSpec((L, 128), lambda i: (0, 0)),    # resident biases
                ],
                out_specs=pl.BlockSpec((tr, 128), lambda i: (i, 0)),
            ),
            compiler_params=compiler_params,
            cost_estimate=cost,
        )(x_r, w_t, b_t)
        return out_r.reshape(B, D)                # free reshape back

    # Natural (B, D) path: already lane-dense when D % 128 == 0; for other D
    # (non-divisor, non-multiple of 128) we accept masked stores rather than
    # paying two full HBM transpose passes.
    tb = _pick_batch_tile(B, D, itemsize, sub_align, tile_budget)
    return pl.pallas_call(
        _crossnet_kernel_rowmajor,
        out_shape=jax.ShapeDtypeStruct((B, D), x.dtype),
        grid_spec=pltpu.PrefetchScalarGridSpec(
            num_scalar_prefetch=0,
            grid=(pl.cdiv(B, tb),),
            in_specs=[
                pl.BlockSpec((tb, D), lambda i: (i, 0)),         # x tile
                pl.BlockSpec((L, D), lambda i: (0, 0)),          # resident weights
                pl.BlockSpec((L, D), lambda i: (0, 0)),          # resident biases
            ],
            out_specs=pl.BlockSpec((tb, D), lambda i: (i, 0)),
        ),
        compiler_params=compiler_params,
        cost_estimate=cost,
    )(x, w, b)


def crossnet_ref(x, w, b):
    x0 = x
    out = x
    for i in range(w.shape[0]):
        xw = jnp.sum(out * w[i][None, :], axis=-1, keepdims=True)
        out = x0 * xw + b[i][None, :] + out
    return out


if __name__ == "__main__":
    num_layers = 3
    batch, input_dim = 8, 32

    key = jax.random.PRNGKey(0)
    kx, kw = jax.random.split(key)
    x = jax.random.normal(kx, (batch, input_dim), dtype=jnp.float32)
    # nn.Linear(input_dim, 1, bias=False) weights: small deterministic uniform.
    bound = 1.0 / (input_dim ** 0.5)
    w = jax.random.uniform(kw, (num_layers, input_dim), dtype=jnp.float32,
                           minval=-bound, maxval=bound)
    # Biases are zero-initialized in the module's __init__.
    b = jnp.zeros((num_layers, input_dim), dtype=jnp.float32)

    out = crossnet_forward(x, w, b)
    jax.block_until_ready(out)
    ref = crossnet_ref(x, w, b)
    assert out.shape == (batch, input_dim)
    assert jnp.allclose(out, ref, atol=1e-5, rtol=1e-5), "mismatch vs reference"

    # Exercise every code path: lane-aligned D, multi-tile packed path,
    # unaligned D (masked-store path), and a batch that defeats the packing.
    for (B2, D2) in ((4, 128), (1024, 32), (64, 48), (10, 32)):
        k1, k2, k3 = jax.random.split(jax.random.PRNGKey(B2 + D2), 3)
        x2 = jax.random.normal(k1, (B2, D2), dtype=jnp.float32)
        w2 = jax.random.normal(k2, (num_layers, D2), dtype=jnp.float32) * 0.1
        b2 = jax.random.normal(k3, (num_layers, D2), dtype=jnp.float32) * 0.1
        o2 = crossnet_forward(x2, w2, b2)
        jax.block_until_ready(o2)
        assert jnp.allclose(o2, crossnet_ref(x2, w2, b2), atol=1e-4, rtol=1e-4), \
            f"mismatch vs reference for shape ({B2}, {D2})"

    print("KERNEL_OK")
</pallas_src>

<mosaic_0001>
module attributes {stable_mosaic.version = 11 : i64} {
  func.func @_crossnet_kernel_packed(%arg0: i32, %arg1: memref<2x128xf32, #tpu.memory_space<vmem>>, %arg2: memref<3x128xf32, #tpu.memory_space<vmem>>, %arg3: memref<3x128xf32, #tpu.memory_space<vmem>>, %arg4: memref<2x128xf32, #tpu.memory_space<vmem>>) attributes {dimension_semantics = [#tpu.dimension_semantics<parallel>], iteration_bounds = array<i64: 1>, scalar_prefetch = 0 : i64, scratch_operands = 0 : i64, tpu.core_type = #tpu.core_type<tc>, window_params = [{transform_indices = @transform_0, window_bounds = array<i64: 2, 128>}, {pipeline_mode = #tpu.pipeline_mode<synchronous>, transform_indices = @transform_1, window_bounds = array<i64: 3, 128>}, {pipeline_mode = #tpu.pipeline_mode<synchronous>, transform_indices = @transform_2, window_bounds = array<i64: 3, 128>}, {transform_indices = @transform_3, window_bounds = array<i64: 2, 128>}]} {
    %c0 = arith.constant 0 : index
    %c0_0 = arith.constant 0 : index
    %0 = vector.load %arg1[%c0, %c0_0] : memref<2x128xf32, #tpu.memory_space<vmem>>, vector<2x128xf32>
    %c0_1 = arith.constant 0 : index
    %c0_2 = arith.constant 0 : index
    %1 = vector.load %arg2[%c0_1, %c0_2] : memref<3x128xf32, #tpu.memory_space<vmem>>, vector<3x128xf32>
    %c0_3 = arith.constant 0 : index
    %c0_4 = arith.constant 0 : index
    %2 = vector.load %arg3[%c0_3, %c0_4] : memref<3x128xf32, #tpu.memory_space<vmem>>, vector<3x128xf32>
    %3 = tpu.iota {dimensions = array<i32: 1>} : vector<2x128xi32>
    %4 = vector.extract_strided_slice %1 {offsets = [0, 0], sizes = [1, 128], strides = [1, 1]} : vector<3x128xf32> to vector<1x128xf32>
    %5 = vector.extract_strided_slice %2 {offsets = [0, 0], sizes = [1, 128], strides = [1, 1]} : vector<3x128xf32> to vector<1x128xf32>
    %6 = vector.broadcast %4 : vector<1x128xf32> to vector<2x128xf32>
    %7 = arith.mulf %0, %6 : vector<2x128xf32>
    %c127_i32 = arith.constant 127 : i32
    %8 = tpu.dynamic_rotate %7 by %c127_i32 dim 1 : vector<2x128xf32>, i32 -> vector<2x128xf32>
    %c1_i32 = arith.constant 1 : i32
    %9 = tpu.dynamic_rotate %7 by %c1_i32 dim 1 : vector<2x128xf32>, i32 -> vector<2x128xf32>
    %c1_i32_5 = arith.constant 1 : i32
    %10 = vector.broadcast %c1_i32_5 : i32 to vector<2x128xi32>
    %11 = arith.andi %3, %10 : vector<2x128xi32>
    %c0_i32 = arith.constant 0 : i32
    %12 = vector.broadcast %c0_i32 : i32 to vector<2x128xi32>
    %13 = arith.cmpi eq, %11, %12 : vector<2x128xi32>
    %14 = arith.select %13, %8, %9 : vector<2x128xi1>, vector<2x128xf32>
    %15 = arith.addf %7, %14 : vector<2x128xf32>
    %c126_i32 = arith.constant 126 : i32
    %16 = tpu.dynamic_rotate %15 by %c126_i32 dim 1 : vector<2x128xf32>, i32 -> vector<2x128xf32>
    %c2_i32 = arith.constant 2 : i32
    %17 = tpu.dynamic_rotate %15 by %c2_i32 dim 1 : vector<2x128xf32>, i32 -> vector<2x128xf32>
    %c2_i32_6 = arith.constant 2 : i32
    %18 = vector.broadcast %c2_i32_6 : i32 to vector<2x128xi32>
    %19 = arith.andi %3, %18 : vector<2x128xi32>
    %c0_i32_7 = arith.constant 0 : i32
    %20 = vector.broadcast %c0_i32_7 : i32 to vector<2x128xi32>
    %21 = arith.cmpi eq, %19, %20 : vector<2x128xi32>
    %22 = arith.select %21, %16, %17 : vector<2x128xi1>, vector<2x128xf32>
    %23 = arith.addf %15, %22 : vector<2x128xf32>
    %c124_i32 = arith.constant 124 : i32
    %24 = tpu.dynamic_rotate %23 by %c124_i32 dim 1 : vector<2x128xf32>, i32 -> vector<2x128xf32>
    %c4_i32 = arith.constant 4 : i32
    %25 = tpu.dynamic_rotate %23 by %c4_i32 dim 1 : vector<2x128xf32>, i32 -> vector<2x128xf32>
    %c4_i32_8 = arith.constant 4 : i32
    %26 = vector.broadcast %c4_i32_8 : i32 to vector<2x128xi32>
    %27 = arith.andi %3, %26 : vector<2x128xi32>
    %c0_i32_9 = arith.constant 0 : i32
    %28 = vector.broadcast %c0_i32_9 : i32 to vector<2x128xi32>
    %29 = arith.cmpi eq, %27, %28 : vector<2x128xi32>
    %30 = arith.select %29, %24, %25 : vector<2x128xi1>, vector<2x128xf32>
    %31 = arith.addf %23, %30 : vector<2x128xf32>
    %c120_i32 = arith.constant 120 : i32
    %32 = tpu.dynamic_rotate %31 by %c120_i32 dim 1 : vector<2x128xf32>, i32 -> vector<2x128xf32>
    %c8_i32 = arith.constant 8 : i32
    %33 = tpu.dynamic_rotate %31 by %c8_i32 dim 1 : vector<2x128xf32>, i32 -> vector<2x128xf32>
    %c8_i32_10 = arith.constant 8 : i32
    %34 = vector.broadcast %c8_i32_10 : i32 to vector<2x128xi32>
    %35 = arith.andi %3, %34 : vector<2x128xi32>
    %c0_i32_11 = arith.constant 0 : i32
    %36 = vector.broadcast %c0_i32_11 : i32 to vector<2x128xi32>
    %37 = arith.cmpi eq, %35, %36 : vector<2x128xi32>
    %38 = arith.select %37, %32, %33 : vector<2x128xi1>, vector<2x128xf32>
    %39 = arith.addf %31, %38 : vector<2x128xf32>
    %c112_i32 = arith.constant 112 : i32
    %40 = tpu.dynamic_rotate %39 by %c112_i32 dim 1 : vector<2x128xf32>, i32 -> vector<2x128xf32>
    %c16_i32 = arith.constant 16 : i32
    %41 = tpu.dynamic_rotate %39 by %c16_i32 dim 1 : vector<2x128xf32>, i32 -> vector<2x128xf32>
    %c16_i32_12 = arith.constant 16 : i32
    %42 = vector.broadcast %c16_i32_12 : i32 to vector<2x128xi32>
    %43 = arith.andi %3, %42 : vector<2x128xi32>
    %c0_i32_13 = arith.constant 0 : i32
    %44 = vector.broadcast %c0_i32_13 : i32 to vector<2x128xi32>
    %45 = arith.cmpi eq, %43, %44 : vector<2x128xi32>
    %46 = arith.select %45, %40, %41 : vector<2x128xi1>, vector<2x128xf32>
    %47 = arith.addf %39, %46 : vector<2x128xf32>
    %48 = arith.mulf %0, %47 : vector<2x128xf32>
    %49 = vector.broadcast %5 : vector<1x128xf32> to vector<2x128xf32>
    %50 = arith.addf %48, %49 : vector<2x128xf32>
    %51 = arith.addf %50, %0 : vector<2x128xf32>
    %52 = vector.extract_strided_slice %1 {offsets = [1, 0], sizes = [1, 128], strides = [1, 1]} : vector<3x128xf32> to vector<1x128xf32>
    %53 = vector.extract_strided_slice %2 {offsets = [1, 0], sizes = [1, 128], strides = [1, 1]} : vector<3x128xf32> to vector<1x128xf32>
    %54 = vector.broadcast %52 : vector<1x128xf32> to vector<2x128xf32>
    %55 = arith.mulf %51, %54 : vector<2x128xf32>
    %c127_i32_14 = arith.constant 127 : i32
    %56 = tpu.dynamic_rotate %55 by %c127_i32_14 dim 1 : vector<2x128xf32>, i32 -> vector<2x128xf32>
    %c1_i32_15 = arith.constant 1 : i32
    %57 = tpu.dynamic_rotate %55 by %c1_i32_15 dim 1 : vector<2x128xf32>, i32 -> vector<2x128xf32>
    %c1_i32_16 = arith.constant 1 : i32
    %58 = vector.broadcast %c1_i32_16 : i32 to vector<2x128xi32>
    %59 = arith.andi %3, %58 : vector<2x128xi32>
    %c0_i32_17 = arith.constant 0 : i32
    %60 = vector.broadcast %c0_i32_17 : i32 to vector<2x128xi32>
    %61 = arith.cmpi eq, %59, %60 : vector<2x128xi32>
    %62 = arith.select %61, %56, %57 : vector<2x128xi1>, vector<2x128xf32>
    %63 = arith.addf %55, %62 : vector<2x128xf32>
    %c126_i32_18 = arith.constant 126 : i32
    %64 = tpu.dynamic_rotate %63 by %c126_i32_18 dim 1 : vector<2x128xf32>, i32 -> vector<2x128xf32>
    %c2_i32_19 = arith.constant 2 : i32
    %65 = tpu.dynamic_rotate %63 by %c2_i32_19 dim 1 : vector<2x128xf32>, i32 -> vector<2x128xf32>
    %c2_i32_20 = arith.constant 2 : i32
    %66 = vector.broadcast %c2_i32_20 : i32 to vector<2x128xi32>
    %67 = arith.andi %3, %66 : vector<2x128xi32>
    %c0_i32_21 = arith.constant 0 : i32
    %68 = vector.broadcast %c0_i32_21 : i32 to vector<2x128xi32>
    %69 = arith.cmpi eq, %67, %68 : vector<2x128xi32>
    %70 = arith.select %69, %64, %65 : vector<2x128xi1>, vector<2x128xf32>
    %71 = arith.addf %63, %70 : vector<2x128xf32>
    %c124_i32_22 = arith.constant 124 : i32
    %72 = tpu.dynamic_rotate %71 by %c124_i32_22 dim 1 : vector<2x128xf32>, i32 -> vector<2x128xf32>
    %c4_i32_23 = arith.constant 4 : i32
    %73 = tpu.dynamic_rotate %71 by %c4_i32_23 dim 1 : vector<2x128xf32>, i32 -> vector<2x128xf32>
    %c4_i32_24 = arith.constant 4 : i32
    %74 = vector.broadcast %c4_i32_24 : i32 to vector<2x128xi32>
    %75 = arith.andi %3, %74 : vector<2x128xi32>
    %c0_i32_25 = arith.constant 0 : i32
    %76 = vector.broadcast %c0_i32_25 : i32 to vector<2x128xi32>
    %77 = arith.cmpi eq, %75, %76 : vector<2x128xi32>
    %78 = arith.select %77, %72, %73 : vector<2x128xi1>, vector<2x128xf32>
    %79 = arith.addf %71, %78 : vector<2x128xf32>
    %c120_i32_26 = arith.constant 120 : i32
    %80 = tpu.dynamic_rotate %79 by %c120_i32_26 dim 1 : vector<2x128xf32>, i32 -> vector<2x128xf32>
    %c8_i32_27 = arith.constant 8 : i32
    %81 = tpu.dynamic_rotate %79 by %c8_i32_27 dim 1 : vector<2x128xf32>, i32 -> vector<2x128xf32>
    %c8_i32_28 = arith.constant 8 : i32
    %82 = vector.broadcast %c8_i32_28 : i32 to vector<2x128xi32>
    %83 = arith.andi %3, %82 : vector<2x128xi32>
    %c0_i32_29 = arith.constant 0 : i32
    %84 = vector.broadcast %c0_i32_29 : i32 to vector<2x128xi32>
    %85 = arith.cmpi eq, %83, %84 : vector<2x128xi32>
    %86 = arith.select %85, %80, %81 : vector<2x128xi1>, vector<2x128xf32>
    %87 = arith.addf %79, %86 : vector<2x128xf32>
    %c112_i32_30 = arith.constant 112 : i32
    %88 = tpu.dynamic_rotate %87 by %c112_i32_30 dim 1 : vector<2x128xf32>, i32 -> vector<2x128xf32>
    %c16_i32_31 = arith.constant 16 : i32
    %89 = tpu.dynamic_rotate %87 by %c16_i32_31 dim 1 : vector<2x128xf32>, i32 -> vector<2x128xf32>
    %c16_i32_32 = arith.constant 16 : i32
    %90 = vector.broadcast %c16_i32_32 : i32 to vector<2x128xi32>
    %91 = arith.andi %3, %90 : vector<2x128xi32>
    %c0_i32_33 = arith.constant 0 : i32
    %92 = vector.broadcast %c0_i32_33 : i32 to vector<2x128xi32>
    %93 = arith.cmpi eq, %91, %92 : vector<2x128xi32>
    %94 = arith.select %93, %88, %89 : vector<2x128xi1>, vector<2x128xf32>
    %95 = arith.addf %87, %94 : vector<2x128xf32>
    %96 = arith.mulf %0, %95 : vector<2x128xf32>
    %97 = vector.broadcast %53 : vector<1x128xf32> to vector<2x128xf32>
    %98 = arith.addf %96, %97 : vector<2x128xf32>
    %99 = arith.addf %98, %51 : vector<2x128xf32>
    %100 = vector.extract_strided_slice %1 {offsets = [2, 0], sizes = [1, 128], strides = [1, 1]} : vector<3x128xf32> to vector<1x128xf32>
    %101 = vector.extract_strided_slice %2 {offsets = [2, 0], sizes = [1, 128], strides = [1, 1]} : vector<3x128xf32> to vector<1x128xf32>
    %102 = vector.broadcast %100 : vector<1x128xf32> to vector<2x128xf32>
    %103 = arith.mulf %99, %102 : vector<2x128xf32>
    %c127_i32_34 = arith.constant 127 : i32
    %104 = tpu.dynamic_rotate %103 by %c127_i32_34 dim 1 : vector<2x128xf32>, i32 -> vector<2x128xf32>
    %c1_i32_35 = arith.constant 1 : i32
    %105 = tpu.dynamic_rotate %103 by %c1_i32_35 dim 1 : vector<2x128xf32>, i32 -> vector<2x128xf32>
    %c1_i32_36 = arith.constant 1 : i32
    %106 = vector.broadcast %c1_i32_36 : i32 to vector<2x128xi32>
    %107 = arith.andi %3, %106 : vector<2x128xi32>
    %c0_i32_37 = arith.constant 0 : i32
    %108 = vector.broadcast %c0_i32_37 : i32 to vector<2x128xi32>
    %109 = arith.cmpi eq, %107, %108 : vector<2x128xi32>
    %110 = arith.select %109, %104, %105 : vector<2x128xi1>, vector<2x128xf32>
    %111 = arith.addf %103, %110 : vector<2x128xf32>
    %c126_i32_38 = arith.constant 126 : i32
    %112 = tpu.dynamic_rotate %111 by %c126_i32_38 dim 1 : vector<2x128xf32>, i32 -> vector<2x128xf32>
    %c2_i32_39 = arith.constant 2 : i32
    %113 = tpu.dynamic_rotate %111 by %c2_i32_39 dim 1 : vector<2x128xf32>, i32 -> vector<2x128xf32>
    %c2_i32_40 = arith.constant 2 : i32
    %114 = vector.broadcast %c2_i32_40 : i32 to vector<2x128xi32>
    %115 = arith.andi %3, %114 : vector<2x128xi32>
    %c0_i32_41 = arith.constant 0 : i32
    %116 = vector.broadcast %c0_i32_41 : i32 to vector<2x128xi32>
    %117 = arith.cmpi eq, %115, %116 : vector<2x128xi32>
    %118 = arith.select %117, %112, %113 : vector<2x128xi1>, vector<2x128xf32>
    %119 = arith.addf %111, %118 : vector<2x128xf32>
    %c124_i32_42 = arith.constant 124 : i32
    %120 = tpu.dynamic_rotate %119 by %c124_i32_42 dim 1 : vector<2x128xf32>, i32 -> vector<2x128xf32>
    %c4_i32_43 = arith.constant 4 : i32
    %121 = tpu.dynamic_rotate %119 by %c4_i32_43 dim 1 : vector<2x128xf32>, i32 -> vector<2x128xf32>
    %c4_i32_44 = arith.constant 4 : i32
    %122 = vector.broadcast %c4_i32_44 : i32 to vector<2x128xi32>
    %123 = arith.andi %3, %122 : vector<2x128xi32>
    %c0_i32_45 = arith.constant 0 : i32
    %124 = vector.broadcast %c0_i32_45 : i32 to vector<2x128xi32>
    %125 = arith.cmpi eq, %123, %124 : vector<2x128xi32>
    %126 = arith.select %125, %120, %121 : vector<2x128xi1>, vector<2x128xf32>
    %127 = arith.addf %119, %126 : vector<2x128xf32>
    %c120_i32_46 = arith.constant 120 : i32
    %128 = tpu.dynamic_rotate %127 by %c120_i32_46 dim 1 : vector<2x128xf32>, i32 -> vector<2x128xf32>
    %c8_i32_47 = arith.constant 8 : i32
    %129 = tpu.dynamic_rotate %127 by %c8_i32_47 dim 1 : vector<2x128xf32>, i32 -> vector<2x128xf32>
    %c8_i32_48 = arith.constant 8 : i32
    %130 = vector.broadcast %c8_i32_48 : i32 to vector<2x128xi32>
    %131 = arith.andi %3, %130 : vector<2x128xi32>
    %c0_i32_49 = arith.constant 0 : i32
    %132 = vector.broadcast %c0_i32_49 : i32 to vector<2x128xi32>
    %133 = arith.cmpi eq, %131, %132 : vector<2x128xi32>
    %134 = arith.select %133, %128, %129 : vector<2x128xi1>, vector<2x128xf32>
    %135 = arith.addf %127, %134 : vector<2x128xf32>
    %c112_i32_50 = arith.constant 112 : i32
    %136 = tpu.dynamic_rotate %135 by %c112_i32_50 dim 1 : vector<2x128xf32>, i32 -> vector<2x128xf32>
    %c16_i32_51 = arith.constant 16 : i32
    %137 = tpu.dynamic_rotate %135 by %c16_i32_51 dim 1 : vector<2x128xf32>, i32 -> vector<2x128xf32>
    %c16_i32_52 = arith.constant 16 : i32
    %138 = vector.broadcast %c16_i32_52 : i32 to vector<2x128xi32>
    %139 = arith.andi %3, %138 : vector<2x128xi32>
    %c0_i32_53 = arith.constant 0 : i32
    %140 = vector.broadcast %c0_i32_53 : i32 to vector<2x128xi32>
    %141 = arith.cmpi eq, %139, %140 : vector<2x128xi32>
    %142 = arith.select %141, %136, %137 : vector<2x128xi1>, vector<2x128xf32>
    %143 = arith.addf %135, %142 : vector<2x128xf32>
    %144 = arith.mulf %0, %143 : vector<2x128xf32>
    %145 = vector.broadcast %101 : vector<1x128xf32> to vector<2x128xf32>
    %146 = arith.addf %144, %145 : vector<2x128xf32>
    %147 = arith.addf %146, %99 : vector<2x128xf32>
    %c0_54 = arith.constant 0 : index
    %c0_55 = arith.constant 0 : index
    %148 = vector.load %arg4[%c0_54, %c0_55] : memref<2x128xf32, #tpu.memory_space<vmem>>, vector<2x128xf32>
    tpu.vector_store %arg4[%c0_54, %c0_55], %147 {strides = array<i32>} : memref<2x128xf32, #tpu.memory_space<vmem>>, vector<2x128xf32>,
    return
  }
  func.func @transform_0(%arg0: i32) -> (i32, i32) {
    %c0_i32 = arith.constant 0 : i32
    %c0_i32_0 = arith.constant 0 : i32
    return %arg0, %c0_i32 : i32, i32
  }
  func.func @transform_1(%arg0: i32) -> (i32, i32) {
    %c0_i32 = arith.constant 0 : i32
    %c0_i32_0 = arith.constant 0 : i32
    %c0_i32_1 = arith.constant 0 : i32
    return %c0_i32, %c0_i32_0 : i32, i32
  }
  func.func @transform_2(%arg0: i32) -> (i32, i32) {
    %c0_i32 = arith.constant 0 : i32
    %c0_i32_0 = arith.constant 0 : i32
    %c0_i32_1 = arith.constant 0 : i32
    return %c0_i32, %c0_i32_0 : i32, i32
  }
  func.func @transform_3(%arg0: i32) -> (i32, i32) {
    %c0_i32 = arith.constant 0 : i32
    %c0_i32_0 = arith.constant 0 : i32
    return %arg0, %c0_i32 : i32, i32
  }
}

</mosaic_0001>

<bundles_post_ra>
// kernel: tile.14
= control target key start
LH: loop header
LB: loop body
LE: loop exit
PB: predicated region body
PF: predicated region fallthrough
CT: control target
= control target key end

     0   :  { %s47_s12 = smov 32   ;;  %s48_s13 = smov 64   ;;  %vm15_vm0 = vcmask 261120   ;;  %vm21_vm1 = vcmask 1048320   ;;  %vm27_vm2 = vcmask 785920   ;;  %vm33_vm3 = vcmask 523520   ;;  %s71_s0 = inlined_call_operand.vmem [shape: f32[3,4,32], index: 0, kind: input, shape index: {}]   ;;  %s72_s1 = inlined_call_operand.vmem [shape: f32[3,128], index: 1, kind: output, shape index: {}]  }
   0x1   :  { %v41_v0 = vld [vmem:[%s71_s0 + $0x8] sm:$0xf]  ;;  %v42_v1 = vld [vmem:[%s71_s0 + $0x4] sm:$0xf]  ;;  %v12_v2 = vld [vmem:[%s71_s0] sm:$0xf] }
   0x2   :  { %7 = vst [vmem:[#allocation1 + $0x10] sm:$0xf] %v41_v0  ;;  %s46_s0 = smov 96  }
   0x3   :  { %11 = vst [vmem:[#allocation1 + $0x8] sm:$0xf] %v42_v1 }
   0x4   :  { %13 = vst [vmem:[#allocation1] sm:$0xf] %v12_v2 }
   0xb   :  { %v18_v3 = vld [vmem:[#allocation1 + $0x3] ss:$8 sm:$0x7]   ;;  %v30_v4 = vld [vmem:[#allocation1 + $0x1] ss:$8 sm:$0x7]  }
   0xc   :  { %19 = vrot.lane.b32.xlu0 %v18_v3, %s46_s0  ;;  %31 = vrot.lane.b32.xlu1 %v30_v4, %s47_s12  ;;  %v24_v5 = vld [vmem:[#allocation1 + $0x2] ss:$8 sm:$0x7]   ;;  %v14_v6 = vld [vmem:[#allocation1] ss:$8 sm:$0x7]  }
   0xd   :  { %16 = vst.msk [vmem:[#allocation0] sm:$0x7] %vm15_vm0, %v14_v6  }
  0x14   :  { %25 = vrot.lane.b32.xlu0 %v24_v5, %s48_s13 }
  0x7e   :  { %v20_v7 = vpop.permute.xlu0 %19   ;;  %v32_v8 = vpop.permute.xlu1 %31  }
  0x7f   :  { %22 = vst.msk [vmem:[#allocation0] sm:$0x7] %vm21_vm1, %v20_v7  }
  0x86   :  { %v26_v9 = vpop.permute.xlu0 %25  }
  0x87   :  { %28 = vst.msk [vmem:[#allocation0] sm:$0x7] %vm27_vm2, %v26_v9  }
  0x88   :  { %34 = vst.msk [vmem:[#allocation0] sm:$0x7] %vm33_vm3, %v32_v8  }
  0x8f   :  { %v37_v10 = vld [vmem:[#allocation0] sm:$0xf] }
  0x90   :  { %40 = vst [vmem:[%s72_s1] sm:$0xf] %v37_v10 }

// kernel: crossnet_forward.1
= control target key start
LH: loop header
LB: loop body
LE: loop exit
PB: predicated region body
PF: predicated region fallthrough
CT: control target
= control target key end

     0   :  { %s152_s16 = smov 127   ;;  %s153_s17 = smov 1   ;;  %v17_v4 = vlaneseq  ;;  %s291_s0 = inlined_call_operand.vmem [shape: f32[2,128], index: 0, kind: input, shape index: {}]   ;;  %s292_s1 = inlined_call_operand.vmem [shape: f32[3,128], index: 1, kind: input, shape index: {}]   ;;  %s293_s2 = inlined_call_operand.vmem [shape: f32[3,128], index: 2, kind: input, shape index: {}]   ;;  %s294_s3 = inlined_call_operand.vmem [shape: f32[2,128], index: 3, kind: output, shape index: {}]  }
   0x1   :  { %v185_v0 = vld [vmem:[%s291_s0] sm:$0x3]  ;;  %s154_s0 = smov 126   ;;  %s156_s18 = smov 124  }
   0x2   :  { %v190_v1 = vld [vmem:[%s292_s1] sm:$0x7]  ;;  %v18_v5 = vand.u32 127, %v17_v4  ;;  %s155_s1 = smov 2   ;;  %s157_s19 = smov 4  }
   0x3   :  { %v19_v2 = vperm.slane %v190_v1, 0  ;;  %s158_s20 = smov 8   ;;  %s159_s21 = smov 120   ;;  %v235_v32 = vld [vmem:[%s293_s2] sm:$0x7]  ;;  %v65_v40 = vperm.slane %v190_v1, 1 }
   0x4   :  { %v25_v7 = vand.u32 1, %v18_v5  ;;  %v33_v13 = vand.u32 2, %v18_v5  ;;  %v41_v19 = vand.u32 4, %v18_v5  ;;  %v49_v24 = vand.u32 8, %v18_v5  ;;  %s160_s22 = smov 16   ;;  %s161_s23 = smov 112  }
   0x5   :  { %v20_v3 = vmul.f32 %v19_v2, %v185_v0  ;;  %v57_v30 = vand.u32 16, %v18_v5  ;;  %v62_v36 = vperm.slane %v235_v32, 0  ;;  %v98_v62 = vperm.slane %v235_v32, 1 }
   0x6   :  { %vm196_vm0 = vcmp.eq.s32.totalorder %v25_v7, 0  ;;  %vm204_vm1 = vcmp.eq.s32.totalorder %v33_v13, 0  ;;  %vm212_vm2 = vcmp.eq.s32.totalorder %v41_v19, 0  ;;  %vm220_vm3 = vcmp.eq.s32.totalorder %v49_v24, 0 }
   0x7   :  { %21 = vrot.lane.b32.xlu0 %v20_v3, %s152_s16  ;;  %vm228_vm4 = vcmp.eq.s32.totalorder %v57_v30, 0  ;;  %v101_v4 = vperm.slane %v190_v1, 2 }
   0xf   :  { %23 = vrot.lane.b32.xlu0 %v20_v3, %s153_s17 }
  0x79   :  { %v22_v6 = vpop.permute.xlu0 %21 }
  0x81   :  { %v24_v9 = vpop.permute.xlu0 %23 }
  0x82   :  { %v27_v10 = vsel %vm196_vm0, %v22_v6, %v24_v9 }
  0x83   :  { %v28_v11 = vadd.f32 %v27_v10, %v20_v3 }
  0x85   :  { %29 = vrot.lane.b32.xlu1 %v28_v11, %s154_s0 }
  0x8d   :  { %31 = vrot.lane.b32.xlu1 %v28_v11, %s155_s1 }
  0xf7   :  { %v30_v12 = vpop.permute.xlu1 %29 }
  0xff   :  { %v32_v15 = vpop.permute.xlu1 %31 }
 0x100   :  { %v35_v16 = vsel %vm204_vm1, %v30_v12, %v32_v15 }
 0x101   :  { %v36_v17 = vadd.f32 %v35_v16, %v28_v11 }
 0x103   :  { %37 = vrot.lane.b32.xlu2 %v36_v17, %s156_s18 }
 0x10b   :  { %39 = vrot.lane.b32.xlu2 %v36_v17, %s157_s19 }
 0x15d   :  { %v38_v18 = vpop.permute.xlu2 %37 }
 0x165   :  { %v40_v21 = vpop.permute.xlu2 %39 }
 0x166   :  { %v43_v22 = vsel %vm212_vm2, %v38_v18, %v40_v21 }
 0x167   :  { %v44_v23 = vadd.f32 %v43_v22, %v36_v17 }
 0x169   :  { %47 = vrot.lane.b32.xlu1 %v44_v23, %s158_s20  ;;  %45 = vrot.lane.b32.xlu0 %v44_v23, %s159_s21 }
 0x1db   :  { %v48_v26 = vpop.permute.xlu1 %47  ;;  %v46_v27 = vpop.permute.xlu0 %45 }
 0x1dc   :  { %v51_v28 = vsel %vm220_vm3, %v46_v27, %v48_v26  ;;  %v134_v26 = vperm.slane %v235_v32, 2 }
 0x1dd   :  { %v52_v29 = vadd.f32 %v51_v28, %v44_v23 }
 0x1df   :  { %55 = vrot.lane.b32.xlu0 %v52_v29, %s160_s22  ;;  %53 = vrot.lane.b32.xlu2 %v52_v29, %s161_s23 }
 0x239   :  { %v54_v33 = vpop.permute.xlu2 %53 }
 0x251   :  { %v56_v34 = vpop.permute.xlu0 %55 }
 0x252   :  { %v59_v35 = vsel %vm228_vm4, %v54_v33, %v56_v34 }
 0x253   :  { %v60_v37 = vadd.f32 %v59_v35, %v52_v29 }
 0x255   :  { %v61_v38 = vmul.f32 %v60_v37, %v185_v0 }
 0x257   :  { %v63_v39 = vadd.f32 %v62_v36, %v61_v38 }
 0x259   :  { %v64_v41 = vadd.f32 %v63_v39, %v185_v0 }
 0x25b   :  { %v66_v42 = vmul.f32 %v65_v40, %v64_v41 }
 0x25d   :  { %69 = vrot.lane.b32.xlu2 %v66_v42, %s153_s17  ;;  %67 = vrot.lane.b32.xlu1 %v66_v42, %s152_s16 }
 0x2b7   :  { %v70_v43 = vpop.permute.xlu2 %69 }
 0x2cf   :  { %v68_v44 = vpop.permute.xlu1 %67 }
 0x2d0   :  { %v71_v45 = vsel %vm196_vm0, %v68_v44, %v70_v43 }
 0x2d1   :  { %v72_v46 = vadd.f32 %v71_v45, %v66_v42 }
 0x2d3   :  { %75 = vrot.lane.b32.xlu1 %v72_v46, %s155_s1  ;;  %73 = vrot.lane.b32.xlu0 %v72_v46, %s154_s0 }
 0x345   :  { %v76_v47 = vpop.permute.xlu1 %75  ;;  %v74_v48 = vpop.permute.xlu0 %73 }
 0x346   :  { %v77_v49 = vsel %vm204_vm1, %v74_v48, %v76_v47 }
 0x347   :  { %v78_v50 = vadd.f32 %v77_v49, %v72_v46 }
 0x349   :  { %81 = vrot.lane.b32.xlu0 %v78_v50, %s157_s19  ;;  %79 = vrot.lane.b32.xlu2 %v78_v50, %s156_s18 }
 0x3a3   :  { %v80_v51 = vpop.permute.xlu2 %79 }
 0x3bb   :  { %v82_v52 = vpop.permute.xlu0 %81 }
 0x3bc   :  { %v83_v53 = vsel %vm212_vm2, %v80_v51, %v82_v52 }
 0x3bd   :  { %v84_v54 = vadd.f32 %v83_v53, %v78_v50 }
 0x3bf   :  { %87 = vrot.lane.b32.xlu2 %v84_v54, %s158_s20  ;;  %85 = vrot.lane.b32.xlu1 %v84_v54, %s159_s21 }
 0x419   :  { %v88_v55 = vpop.permute.xlu2 %87 }
 0x431   :  { %v86_v56 = vpop.permute.xlu1 %85 }
 0x432   :  { %v89_v57 = vsel %vm220_vm3, %v86_v56, %v88_v55 }
 0x433   :  { %v90_v58 = vadd.f32 %v89_v57, %v84_v54 }
 0x435   :  { %93 = vrot.lane.b32.xlu1 %v90_v58, %s160_s22  ;;  %91 = vrot.lane.b32.xlu0 %v90_v58, %s161_s23 }
 0x4a7   :  { %v94_v59 = vpop.permute.xlu1 %93  ;;  %v92_v60 = vpop.permute.xlu0 %91 }
 0x4a8   :  { %v95_v61 = vsel %vm228_vm4, %v92_v60, %v94_v59 }
 0x4a9   :  { %v96_v63 = vadd.f32 %v95_v61, %v90_v58 }
 0x4ab   :  { %v97_v2 = vmul.f32 %v96_v63, %v185_v0 }
 0x4ad   :  { %v99_v3 = vadd.f32 %v98_v62, %v97_v2 }
 0x4af   :  { %v100_v5 = vadd.f32 %v99_v3, %v64_v41 }
 0x4b1   :  { %v102_v6 = vmul.f32 %v101_v4, %v100_v5 }
 0x4b3   :  { %105 = vrot.lane.b32.xlu0 %v102_v6, %s153_s17  ;;  %103 = vrot.lane.b32.xlu2 %v102_v6, %s152_s16 }
 0x50d   :  { %v104_v7 = vpop.permute.xlu2 %103 }
 0x525   :  { %v106_v9 = vpop.permute.xlu0 %105 }
 0x526   :  { %v107_v10 = vsel %vm196_vm0, %v104_v7, %v106_v9 }
 0x527   :  { %v108_v11 = vadd.f32 %v107_v10, %v102_v6 }
 0x529   :  { %111 = vrot.lane.b32.xlu2 %v108_v11, %s155_s1  ;;  %109 = vrot.lane.b32.xlu1 %v108_v11, %s154_s0 }
 0x583   :  { %v112_v12 = vpop.permute.xlu2 %111 }
 0x59b   :  { %v110_v13 = vpop.permute.xlu1 %109 }
 0x59c   :  { %v113_v1 = vsel %vm204_vm1, %v110_v13, %v112_v12 }
 0x59d   :  { %v114_v15 = vadd.f32 %v113_v1, %v108_v11 }
 0x59f   :  { %117 = vrot.lane.b32.xlu1 %v114_v15, %s157_s19  ;;  %115 = vrot.lane.b32.xlu0 %v114_v15, %s156_s18 }
 0x611   :  { %v118_v16 = vpop.permute.xlu1 %117  ;;  %v116_v17 = vpop.permute.xlu0 %115 }
 0x612   :  { %v119_v8 = vsel %vm212_vm2, %v116_v17, %v118_v16 }
 0x613   :  { %v120_v18 = vadd.f32 %v119_v8, %v114_v15 }
 0x615   :  { %123 = vrot.lane.b32.xlu0 %v120_v18, %s158_s20  ;;  %121 = vrot.lane.b32.xlu2 %v120_v18, %s159_s21 }
 0x66f   :  { %v122_v19 = vpop.permute.xlu2 %121 }
 0x687   :  { %v124_v21 = vpop.permute.xlu0 %123 }
 0x688   :  { %v125_v14 = vsel %vm220_vm3, %v122_v19, %v124_v21 }
 0x689   :  { %v126_v22 = vadd.f32 %v125_v14, %v120_v18 }
 0x68b   :  { %129 = vrot.lane.b32.xlu2 %v126_v22, %s160_s22  ;;  %127 = vrot.lane.b32.xlu1 %v126_v22, %s161_s23 }
 0x6e5   :  { %v130_v23 = vpop.permute.xlu2 %129 }
 0x6fd   :  { %v128_v24 = vpop.permute.xlu1 %127 }
 0x6fe   :  { %v131_v20 = vsel %vm228_vm4, %v128_v24, %v130_v23 }
 0x6ff   :  { %v132_v27 = vadd.f32 %v131_v20, %v126_v22 }
 0x701   :  { %v133_v28 = vmul.f32 %v132_v27, %v185_v0 }
 0x703   :  { %v135_v29 = vadd.f32 %v134_v26, %v133_v28 }
 0x705   :  { %v136_v30 = vadd.f32 %v135_v29, %v100_v5 }
 0x707   :  { %137 = vst [vmem:[%s294_s3] sm:$0x3] %v136_v30 }

</bundles_post_ra>
